<compile_context>
chip_gen: v7x
topology: tpu7x:2x2x1
jax: 0.10.0
libtpu: 0.0.40
codegen_flags: <defaults>
</compile_context>

<pallas_src>
import jax
import jax.numpy as jnp
from jax.experimental import pallas as pl
from jax.experimental.pallas import tpu as pltpu


def _sigmoid(z):
    # 0.5*(tanh(z/2)+1): one EUP transcendental, no overflowing exp intermediate.
    return 0.5 * (jnp.tanh(0.5 * z) + 1.0)


# ---------------------------------------------------------------------------
# Kernels
# ---------------------------------------------------------------------------
def pse_kernel_folded(x_ref, w1c_ref, w23c_ref, o_ref):
    """x block: (Bt, C, HW), lane axis = HW.  Pooling folded into the weights."""
    xf = x_ref[...].astype(jnp.float32)   # native-dtype load, f32 compute
                                          # (v5e VPU/EUP have no bf16 datapath)
    # Two tile reductions; the per-h / per-w pooling lives inside w23c.
    # (If v7x bundle dumps show the XLU slot binding, these can move to the
    #  otherwise-idle MXU as dot(x, ones) / dot(ones, x).)
    p1 = jnp.sum(xf, axis=2)              # (Bt, C)  : lane reduce
    t = jnp.sum(xf, axis=1)               # (Bt, HW) : cross-sublane adds

    s1 = _sigmoid(jnp.dot(p1, w1c_ref[...], preferred_element_type=jnp.float32))
    s23 = _sigmoid(jnp.dot(t, w23c_ref[...], preferred_element_type=jnp.float32))
    c = s1.shape[-1]
    scale = s1 + s23[:, :c] + s23[:, c:]  # (Bt, C)

    o_ref[...] = (xf * scale[:, :, None]).astype(o_ref.dtype)


def pse_kernel_unfolded(x_ref, w1t_ref, w2t_ref, w3t_ref, o_ref):
    """Large-H*W path: x block (Bt, C, H, W), original small (transposed) weights."""
    xf = x_ref[...].astype(jnp.float32)
    xs = jnp.sum(xf, axis=3)              # (Bt, C, H)
    p1 = jnp.sum(xs, axis=2)              # (Bt, C)
    xc = jnp.sum(xf, axis=1)              # (Bt, H, W) channel sum
    p2 = jnp.sum(xc, axis=2)              # (Bt, H)
    p3 = jnp.sum(xc, axis=1)              # (Bt, W)

    s1 = _sigmoid(jnp.dot(p1, w1t_ref[...], preferred_element_type=jnp.float32))
    s2 = _sigmoid(jnp.dot(p2, w2t_ref[...], preferred_element_type=jnp.float32))
    s3 = _sigmoid(jnp.dot(p3, w3t_ref[...], preferred_element_type=jnp.float32))
    scale = s1 + s2 + s3                  # (Bt, C)

    o_ref[...] = (xf * scale[:, :, None, None]).astype(o_ref.dtype)


# ---------------------------------------------------------------------------
# Sizing helpers (generation-aware)
# ---------------------------------------------------------------------------
def _tpu_vmem_bytes():
    try:
        return int(pltpu.get_tpu_info().vmem_capacity_bytes)
    except Exception:
        return 64 << 20                    # conservative default (v7x per-core)


def _pick_batch_tile(batch, image_bytes, target_bytes):
    """Largest Bt with Bt*image_bytes <= target; keep >=2 grid steps when
    possible and prefer an even grid-step count (v7x shards the 'parallel'
    axis across 2 TensorCores)."""
    bt = max(1, min(batch, int(target_bytes) // max(int(image_bytes), 1)))
    if batch >= 2:
        bt = min(bt, batch // 2)
    for cand in range(bt, max(1, bt // 2) - 1, -1):
        if (-(-batch // cand)) % 2 == 0:
            return cand
    return bt


# ---------------------------------------------------------------------------
# Wrapper
# ---------------------------------------------------------------------------
def permute_se_v3(x, w1, w2, w3, *, force_unfolded=False):
    """x: (B,C,H,W); w1: (C,C); w2: (C,H); w3: (C,W). Returns (B,C,H,W), x.dtype."""
    B, C, H, W = x.shape
    HW = H * W
    in_dtype = x.dtype
    itemsize = jnp.dtype(in_dtype).itemsize

    # --- generation-aware tile / VMEM sizing -------------------------------
    vmem_cap = _tpu_vmem_bytes()
    if vmem_cap >= (96 << 20):          # v5e / v6e: 128 MiB VMEM per core
        target_f32_block = 8 << 20
        vmem_limit_cap = 96 << 20
    else:                               # v7x: 64 MiB physical, 32 MiB scoped default
        target_f32_block = 4 << 20
        vmem_limit_cap = 44 << 20

    img_f32_bytes = C * HW * 4          # size by the f32 in-kernel footprint
    bt = _pick_batch_tile(B, img_f32_bytes, target_f32_block)
    grid = (pl.cdiv(B, bt),)            # partial last block is padded; padded
                                        # batch rows only touch discarded output rows

    # Folded (HW, C) weights only while they stay small; otherwise unfolded
    # kernel (tiny weights, VMEM-safe on v7x for large H*W).
    folded_w_bytes = 2 * HW * C * 4
    use_folded = (not force_unfolded) and folded_w_bytes <= (4 << 20)

    native_block = bt * C * HW * itemsize
    f32_block = bt * img_f32_bytes
    w_bytes = C * C * 4 + (folded_w_bytes if use_folded else (H + W) * C * 4)
    # in/out double-buffered native blocks + f32 in-kernel intermediates +
    # (double-buffered) weights + headroom.
    vmem_limit = int(min(
        vmem_limit_cap,
        max(32 << 20, 4 * native_block + 3 * f32_block + 4 * w_bytes + (2 << 20))))

    params = pltpu.CompilerParams(dimension_semantics=("parallel",),
                                  vmem_limit_bytes=vmem_limit)

    w1f = w1.astype(jnp.float32)
    w2f = w2.astype(jnp.float32)
    w3f = w3.astype(jnp.float32)

    if use_folded:
        # Fold pooling normalisation and the hw -> (h, w) selection into the
        # conv weights (tiny host-side ops; precomputed once at init in a model).
        hw_idx = jnp.arange(HW)
        m_h = (hw_idx[:, None] // W == jnp.arange(H)[None, :]).astype(jnp.float32)
        m_w = (hw_idx[:, None] % W == jnp.arange(W)[None, :]).astype(jnp.float32)
        w1c = jnp.transpose(w1f) / float(HW)                        # (C, C)
        w2c = (m_h @ jnp.transpose(w2f)) / float(C * W)             # (HW, C)
        w3c = (m_w @ jnp.transpose(w3f)) / float(C * H)             # (HW, C)
        w23c = jnp.concatenate([w2c, w3c], axis=1)                  # (HW, 2C)

        xr = x.reshape(B, C, HW)        # contiguous trailing-dim merge, no copy
        out = pl.pallas_call(
            pse_kernel_folded,
            out_shape=jax.ShapeDtypeStruct((B, C, HW), in_dtype),
            grid_spec=pltpu.PrefetchScalarGridSpec(
                num_scalar_prefetch=0,
                grid=grid,
                in_specs=[
                    pl.BlockSpec((bt, C, HW), lambda b: (b, 0, 0)),
                    pl.BlockSpec((C, C), lambda b: (0, 0)),
                    pl.BlockSpec((HW, 2 * C), lambda b: (0, 0)),
                ],
                out_specs=pl.BlockSpec((bt, C, HW), lambda b: (b, 0, 0)),
            ),
            compiler_params=params,
        )(xr, w1c, w23c)
        return out.reshape(B, C, H, W)

    # Unfolded path: x stays 4-D, original small weights (transposed, pooling
    # normalisation baked in).
    w1t = jnp.transpose(w1f) / float(HW)                            # (C, C)
    w2t = jnp.transpose(w2f) / float(C * W)                         # (H, C)
    w3t = jnp.transpose(w3f) / float(C * H)                         # (W, C)
    out = pl.pallas_call(
        pse_kernel_unfolded,
        out_shape=jax.ShapeDtypeStruct((B, C, H, W), in_dtype),
        grid_spec=pltpu.PrefetchScalarGridSpec(
            num_scalar_prefetch=0,
            grid=grid,
            in_specs=[
                pl.BlockSpec((bt, C, H, W), lambda b: (b, 0, 0, 0)),
                pl.BlockSpec((C, C), lambda b: (0, 0)),
                pl.BlockSpec((H, C), lambda b: (0, 0)),
                pl.BlockSpec((W, C), lambda b: (0, 0)),
            ],
            out_specs=pl.BlockSpec((bt, C, H, W), lambda b: (b, 0, 0, 0)),
        ),
        compiler_params=params,
    )(x, w1t, w2t, w3t)
    return out


def reference(x, w1, w2, w3):
    """Pure-JAX reference mirroring the PyTorch forward (NCHW)."""
    p1 = jnp.mean(x, axis=(2, 3))                                       # (B, C)
    p2 = jnp.mean(jnp.transpose(x, (0, 2, 1, 3)), axis=(2, 3))          # (B, H)
    p3 = jnp.mean(jnp.transpose(x, (0, 3, 2, 1)), axis=(2, 3))          # (B, W)
    s1 = jax.nn.sigmoid(p1 @ w1.T)
    s2 = jax.nn.sigmoid(p2 @ w2.T)
    s3 = jax.nn.sigmoid(p3 @ w3.T)
    scale = (s1 + s2 + s3)[:, :, None, None]
    return scale * x


if __name__ == "__main__":
    B, C, H, W = 2, 8, 16, 16

    key = jax.random.PRNGKey(0)
    kx, k1, k2, k3, kx2 = jax.random.split(key, 5)

    x = jax.random.normal(kx, (B, C, H, W), dtype=jnp.float32)

    # Deterministic 1x1 conv weights (bias=False), uniform(-1/sqrt(fan_in), +).
    def init_w(k, c_out, c_in):
        bound = 1.0 / jnp.sqrt(jnp.float32(c_in))
        return jax.random.uniform(k, (c_out, c_in), jnp.float32, -bound, bound)

    w1 = init_w(k1, C, C)   # conv1: (C_out, C_in)
    w2 = init_w(k2, C, H)   # conv2: (C_out, H)
    w3 = init_w(k3, C, W)   # conv3: (C_out, W)

    # 1) Folded-weights path, f32 I/O.
    out = jax.block_until_ready(permute_se_v3(x, w1, w2, w3))
    ref = reference(x, w1, w2, w3)
    assert out.shape == (B, C, H, W) and out.dtype == x.dtype
    assert jnp.allclose(out, ref, atol=1e-5, rtol=1e-5), "folded f32 mismatch"

    # 2) Unfolded (large-H*W fallback) path, f32 I/O.
    out_u = jax.block_until_ready(permute_se_v3(x, w1, w2, w3, force_unfolded=True))
    assert jnp.allclose(out_u, ref, atol=1e-5, rtol=1e-5), "unfolded f32 mismatch"

    # 3) Native bf16 I/O (upcast in-register, f32 compute, downcast on store).
    xb = x.astype(jnp.bfloat16)
    out_b = jax.block_until_ready(permute_se_v3(xb, w1, w2, w3))
    ref_b = reference(xb.astype(jnp.float32), w1, w2, w3)
    assert out_b.dtype == jnp.bfloat16
    assert jnp.allclose(out_b.astype(jnp.float32), ref_b, atol=3e-2, rtol=3e-2), \
        "bf16 mismatch"

    # 4) Odd batch -> pl.cdiv grid with a padded partial last block.
    B2 = 5
    x5 = jax.random.normal(kx2, (B2, C, H, W), dtype=jnp.float32)
    out5 = jax.block_until_ready(permute_se_v3(x5, w1, w2, w3))
    ref5 = reference(x5, w1, w2, w3)
    assert jnp.allclose(out5, ref5, atol=1e-5, rtol=1e-5), "partial-block mismatch"

    print("KERNEL_OK")
</pallas_src>

<mosaic_0001>
module attributes {stable_mosaic.version = 11 : i64} {
  func.func @pse_kernel_folded(%arg0: i32, %arg1: memref<1x8x256xf32, #tpu.memory_space<vmem>>, %arg2: memref<8x8xf32, #tpu.memory_space<vmem>>, %arg3: memref<256x16xf32, #tpu.memory_space<vmem>>, %arg4: memref<1x8x256xf32, #tpu.memory_space<vmem>>) attributes {dimension_semantics = [#tpu.dimension_semantics<parallel>], iteration_bounds = array<i64: 2>, scalar_prefetch = 0 : i64, scratch_operands = 0 : i64, tpu.core_type = #tpu.core_type<tc>, window_params = [{transform_indices = @transform_0, window_bounds = array<i64: 1, 8, 256>}, {pipeline_mode = #tpu.pipeline_mode<synchronous>, transform_indices = @transform_1, window_bounds = array<i64: 8, 8>}, {pipeline_mode = #tpu.pipeline_mode<synchronous>, transform_indices = @transform_2, window_bounds = array<i64: 256, 16>}, {transform_indices = @transform_3, window_bounds = array<i64: 1, 8, 256>}]} {
    %c0 = arith.constant 0 : index
    %c0_0 = arith.constant 0 : index
    %c0_1 = arith.constant 0 : index
    %0 = vector.load %arg1[%c0, %c0_0, %c0_1] : memref<1x8x256xf32, #tpu.memory_space<vmem>>, vector<1x8x256xf32>
    %cst = arith.constant dense<0.000000e+00> : vector<1x8xf32>
    %1 = vector.multi_reduction <add>, %0, %cst [2] : vector<1x8x256xf32> to vector<1x8xf32>
    %cst_2 = arith.constant dense<0.000000e+00> : vector<1x256xf32>
    %2 = vector.multi_reduction <add>, %0, %cst_2 [1] : vector<1x8x256xf32> to vector<1x256xf32>
    %c0_3 = arith.constant 0 : index
    %c0_4 = arith.constant 0 : index
    %3 = vector.load %arg2[%c0_3, %c0_4] : memref<8x8xf32, #tpu.memory_space<vmem>>, vector<8x8xf32>
    %cst_5 = arith.constant dense<0.000000e+00> : vector<1x8xf32>
    %4 = tpu.matmul %1, %3, %cst_5 {dimension_numbers = #tpu.dot_dimension_numbers<[1], [0], [0], [1], [0, 0, 1, 1], [], []>} : vector<1x8xf32>, vector<8x8xf32>, vector<1x8xf32> -> vector<1x8xf32>
    %cst_6 = arith.constant 5.000000e-01 : f32
    %5 = vector.broadcast %cst_6 : f32 to vector<1x8xf32>
    %6 = arith.mulf %5, %4 : vector<1x8xf32>
    %7 = math.tanh %6 : vector<1x8xf32>
    %cst_7 = arith.constant 1.000000e+00 : f32
    %8 = vector.broadcast %cst_7 : f32 to vector<1x8xf32>
    %9 = arith.addf %7, %8 : vector<1x8xf32>
    %cst_8 = arith.constant 5.000000e-01 : f32
    %10 = vector.broadcast %cst_8 : f32 to vector<1x8xf32>
    %11 = arith.mulf %10, %9 : vector<1x8xf32>
    %c0_9 = arith.constant 0 : index
    %c0_10 = arith.constant 0 : index
    %12 = vector.load %arg3[%c0_9, %c0_10] : memref<256x16xf32, #tpu.memory_space<vmem>>, vector<256x16xf32>
    %cst_11 = arith.constant dense<0.000000e+00> : vector<1x16xf32>
    %13 = tpu.matmul %2, %12, %cst_11 {dimension_numbers = #tpu.dot_dimension_numbers<[1], [0], [0], [1], [0, 0, 1, 1], [], []>} : vector<1x256xf32>, vector<256x16xf32>, vector<1x16xf32> -> vector<1x16xf32>
    %cst_12 = arith.constant 5.000000e-01 : f32
    %14 = vector.broadcast %cst_12 : f32 to vector<1x16xf32>
    %15 = arith.mulf %14, %13 : vector<1x16xf32>
    %16 = math.tanh %15 : vector<1x16xf32>
    %cst_13 = arith.constant 1.000000e+00 : f32
    %17 = vector.broadcast %cst_13 : f32 to vector<1x16xf32>
    %18 = arith.addf %16, %17 : vector<1x16xf32>
    %cst_14 = arith.constant 5.000000e-01 : f32
    %19 = vector.broadcast %cst_14 : f32 to vector<1x16xf32>
    %20 = arith.mulf %19, %18 : vector<1x16xf32>
    %21 = vector.extract_strided_slice %20 {offsets = [0, 0], sizes = [1, 8], strides = [1, 1]} : vector<1x16xf32> to vector<1x8xf32>
    %22 = arith.addf %11, %21 : vector<1x8xf32>
    %23 = vector.extract_strided_slice %20 {offsets = [0, 8], sizes = [1, 8], strides = [1, 1]} : vector<1x16xf32> to vector<1x8xf32>
    %24 = arith.addf %22, %23 : vector<1x8xf32>
    %25 = vector.shape_cast %24 : vector<1x8xf32> to vector<1x8x1xf32>
    %26 = vector.broadcast %25 : vector<1x8x1xf32> to vector<1x8x256xf32>
    %27 = arith.mulf %0, %26 : vector<1x8x256xf32>
    %c0_15 = arith.constant 0 : index
    %c0_16 = arith.constant 0 : index
    %c0_17 = arith.constant 0 : index
    %28 = vector.load %arg4[%c0_15, %c0_16, %c0_17] : memref<1x8x256xf32, #tpu.memory_space<vmem>>, vector<1x8x256xf32>
    tpu.vector_store %arg4[%c0_15, %c0_16, %c0_17], %27 {strides = array<i32>} : memref<1x8x256xf32, #tpu.memory_space<vmem>>, vector<1x8x256xf32>,
    return
  }
  func.func @transform_0(%arg0: i32) -> (i32, i32, i32) {
    %c0_i32 = arith.constant 0 : i32
    %c0_i32_0 = arith.constant 0 : i32
    %c0_i32_1 = arith.constant 0 : i32
    return %arg0, %c0_i32, %c0_i32_0 : i32, i32, i32
  }
  func.func @transform_1(%arg0: i32) -> (i32, i32) {
    %c0_i32 = arith.constant 0 : i32
    %c0_i32_0 = arith.constant 0 : i32
    %c0_i32_1 = arith.constant 0 : i32
    return %c0_i32, %c0_i32_0 : i32, i32
  }
  func.func @transform_2(%arg0: i32) -> (i32, i32) {
    %c0_i32 = arith.constant 0 : i32
    %c0_i32_0 = arith.constant 0 : i32
    %c0_i32_1 = arith.constant 0 : i32
    return %c0_i32, %c0_i32_0 : i32, i32
  }
  func.func @transform_3(%arg0: i32) -> (i32, i32, i32) {
    %c0_i32 = arith.constant 0 : i32
    %c0_i32_0 = arith.constant 0 : i32
    %c0_i32_1 = arith.constant 0 : i32
    return %arg0, %c0_i32, %c0_i32_0 : i32, i32, i32
  }
}

</mosaic_0001>

<bundles_post_ra>
// kernel: tpu_custom_call.1
= control target key start
LH: loop header
LB: loop body
LE: loop exit
PB: predicated region body
PF: predicated region fallthrough
CT: control target
= control target key end

     0   :  { %8 = vsyncpa [#allocation3], 0  ;;  %s902_s0 = inlined_call_operand.vmem [shape: f32[2,8,256], index: 0, kind: input, shape index: {}]   ;;  %s903_s1 = inlined_call_operand.vmem [shape: f32[8,8], index: 1, kind: input, shape index: {}]   ;;  %s904_s2 = inlined_call_operand.vmem [shape: f32[256,16], index: 2, kind: input, shape index: {}]   ;;  %s905_s3 = inlined_call_operand.hbm [shape: f32[2,8,256], index: 3, kind: output, shape index: {}]  }
   0x1   :  { %10 = vsyncpa [#allocation3 + $0x1], 0  ;;  %s691_s12 = smov 0   ;;  %s693_s13 = smov 0  }
   0x2   :  { %s695_s14 = smov 0   ;;  %s697_s15 = smov 0  }
   0x3 LB: > { %s712_s16 = sadd.s32 4294967295, %s665_s15   ;;  %s468_s17 = sadd.s32 4294967294, %s665_s15   ;;  %s665_s15 = sphi %s697_s15, %s911_s15   ;;  %s661_s14 = sphi %s695_s14, %s910_s14   ;;  %s657_s13 = sphi %s693_s13, %s909_s13   ;;  %s653_s12 = sphi %s691_s12, %s908_s12  }
   0x4   : > { %s716_s18 = sadd.s32 1, %s665_s15   ;;  %s91_s19 = sadd.s32 1, %s661_s14 }
   0x5   : > { %s88_s20 = ssub.s32 %s665_s15, %s716_s18  ;;  %p101_p0 = scmp.ne.s32.totalorder %s661_s14, %s657_s13 }
   0x6   : > { %p89_p1 = scmp.eq.s32.totalorder %s88_s20, 0  ;;  %p102_p2 = scmp.eq.s32.totalorder %s712_s16, 1 }
   0x7   : > { %p107_p3 = scmp.ne.s32.totalorder %s657_s13, %s653_s12  ;;  %p108_p4 = scmp.eq.s32.totalorder %s468_s17, 1 }
   0x8   : > { %s727_s21 = scalar_select %p89_p1, %s661_s14, %s91_s19  }
   0x9   : > { %p729_p5 = por %p102_p2, %p101_p0  ;;  %p733_p6 = por %p108_p4, %p107_p3 }
   0xa   : > { %p471_p7 = scmp.ge.s32.totalorder %s665_s15, 1  ;;  %p140_p8 = scmp.lt.s32.totalorder %s665_s15, 3 }
   0xc   : > { %p141_p9 = pnand %p471_p7, %p140_p8 }
   0xd   : > { %v287_v0 = vld [vmem:[%s904_s2 + $0x80] sm:$0xff] (!%p141_p9)  ;;  %v288_v1 = vld [vmem:[%s904_s2 + $0x88] sm:$0xff] (!%p141_p9)  ;;  %p164_p10 = scmp.lt.s32.totalorder (!%p141_p9), %s712_s16, 1  ;;  %v289_v5 = vld [vmem:[%s904_s2 + $0x90] sm:$0xff] (!%p141_p9)  ;;  %v667_v56 = vmov (!%p141_p9), 0.0   ;;  %vm668_vm0 = vmmov (!%p141_p9), 0  }
   0xe   : > { %144 = sbr.rel (%p141_p9) target bundleno = 538 (0x21a), region = 32  ;;  %v271_v2 = vld [vmem:[%s904_s2] sm:$0xff] (!%p141_p9)  ;;  %v525_v3 = vpack.c.bf16 (!%p141_p9), %v288_v1, %v287_v0  ;;  %v272_v4 = vld [vmem:[%s904_s2 + $0x8] sm:$0xff] (!%p141_p9)  ;;  %v290_v6 = vld [vmem:[%s904_s2 + $0x98] sm:$0xff] (!%p141_p9)  ;;  %520 = vmatprep.subr.mxu0 (!%p141_p9), %v667_v56  ;;  %522 = vmatprep.mubr.msk.f32.mxu0 (!%p141_p9), %vm668_vm0, %v667_v56  ;;  %v188_v1 = vlaneseq (!%p141_p9)  ;;  %vm194_vm1 = vcmask (!%p141_p9), 64512   ;;  %s669_s20 = smov (!%p141_p9), 120  }
   0xf   : > { %v527_v7 = vpack.c.bf16 (!%p141_p9), %v272_v4, %v271_v2  ;;  %v529_v8 = vpack.c.bf16 (!%p141_p9), %v290_v6, %v289_v5  ;;  %v273_v9 = vld [vmem:[%s904_s2 + $0x10] sm:$0xff] (!%p141_p9)  ;;  %v274_v10 = vld [vmem:[%s904_s2 + $0x18] sm:$0xff] (!%p141_p9)  ;;  %v291_v11 = vld [vmem:[%s904_s2 + $0xa0] sm:$0xff] (!%p141_p9)  ;;  %s161_s24 = sand.u32 (!%p141_p9), 1, %s657_s13   ;;  %s482_s26 = sshll.u32 (!%p141_p9), %s712_s16, 8 }
  0x10   : > { %526 = vmatprep.subr.bf16.mxu1 (!%p141_p9), %v525_v3  ;;  %v292_v12 = vld [vmem:[%s904_s2 + $0xa8] sm:$0xff] (!%p141_p9)  ;;  %v531_v13 = vpack.c.bf16 (!%p141_p9), %v274_v10, %v273_v9  ;;  %v275_v15 = vld [vmem:[%s904_s2 + $0x20] sm:$0xff] (!%p141_p9)  ;;  %v293_v17 = vld [vmem:[%s904_s2 + $0xb0] sm:$0xff] (!%p141_p9)  ;;  %v189_v2 = vand.u32 (!%p141_p9), 127, %v188_v1  ;;  %v191_v3 = vshrl.u32 (!%p141_p9), %v188_v1, 7  ;;  %s472_s25 = sshll.u32 (!%p141_p9), %s161_s24, 4  ;;  %s860_s4 = scalar_lea.hbm (!%p141_p9), %s905_s3, %s482_s26 }
  0x11   : > { %528 = vmatpush3.bf16.msra.mxu1 (!%p141_p9), %v527_v7  ;;  %v533_v14 = vpack.c.bf16 (!%p141_p9), %v292_v12, %v291_v11  ;;  %v276_v16 = vld [vmem:[%s904_s2 + $0x28] sm:$0xff] (!%p141_p9)  ;;  %v294_v20 = vld [vmem:[%s904_s2 + $0xb8] sm:$0xff] (!%p141_p9)  ;;  %v277_v25 = vld [vmem:[%s904_s2 + $0x30] sm:$0xff] (!%p141_p9)  ;;  %s670_s6 = smov (!%p141_p9), [#allocation2]  }
  0x12   : > { %530 = vmatprep.subr.bf16.mxu1 (!%p141_p9), %v529_v8  ;;  %v535_v23 = vpack.c.bf16 (!%p141_p9), %v276_v16, %v275_v15  ;;  %v537_v24 = vpack.c.bf16 (!%p141_p9), %v294_v20, %v293_v17  ;;  %v278_v26 = vld [vmem:[%s904_s2 + $0x38] sm:$0xff] (!%p141_p9)  ;;  %v295_v28 = vld [vmem:[%s904_s2 + $0xc0] sm:$0xff] (!%p141_p9)  ;;  %v296_v29 = vld [vmem:[%s904_s2 + $0xc8] sm:$0xff] (!%p141_p9)  ;;  %v192_v4 = vsub.s32 (!%p141_p9), %v189_v2, %v191_v3  ;;  %s607_s7 = sshll.u32 (!%p141_p9), %s670_s6, 4  ;;  %s608_s7 = int_to_ptr.vmem [resolvable:$false] %s607_s7 }
  0x13   : > { %v539_v32 = vpack.c.bf16 (!%p141_p9), %v278_v26, %v277_v25  ;;  %v541_v33 = vpack.c.bf16 (!%p141_p9), %v296_v29, %v295_v28  ;;  %v279_v34 = vld [vmem:[%s904_s2 + $0x40] sm:$0xff] (!%p141_p9)  ;;  %v280_v35 = vld [vmem:[%s904_s2 + $0x48] sm:$0xff] (!%p141_p9)  ;;  %v297_v37 = vld [vmem:[%s904_s2 + $0xd0] sm:$0xff] (!%p141_p9)  ;;  %s609_s8 = scalar_lea.vmem (!%p141_p9), %s608_s7, 512 }
  0x14   : > { %v298_v38 = vld [vmem:[%s904_s2 + $0xd8] sm:$0xff] (!%p141_p9)  ;;  %v543_v41 = vpack.c.bf16 (!%p141_p9), %v280_v35, %v279_v34  ;;  %v281_v43 = vld [vmem:[%s904_s2 + $0x50] sm:$0xff] (!%p141_p9)  ;;  %v299_v46 = vld [vmem:[%s904_s2 + $0xe0] sm:$0xff] (!%p141_p9) }
  0x15   : > { %s165_s19 = scalar_select %p164_p10, %s712_s16, 1  ;;  %532 = vmatpush3.bf16.msra.mxu1 %v531_v13  ;;  %v545_v42 = vpack.c.bf16 %v298_v38, %v297_v37  ;;  %v282_v44 = vld [vmem:[%s904_s2 + $0x58] sm:$0xff]  ;;  %v300_v47 = vld [vmem:[%s904_s2 + $0xe8] sm:$0xff]  ;;  %v283_v51 = vld [vmem:[%s904_s2 + $0x60] sm:$0xff] }
  0x16   : > { %534 = vmatprep.subr.bf16.mxu1 %v533_v14  ;;  %v547_v49 = vpack.c.bf16 %v282_v44, %v281_v43  ;;  %v549_v50 = vpack.c.bf16 %v300_v47, %v299_v46  ;;  %v284_v52 = vld [vmem:[%s904_s2 + $0x68] sm:$0xff]  ;;  %v301_v53 = vld [vmem:[%s904_s2 + $0xf0] sm:$0xff]  ;;  %v302_v54 = vld [vmem:[%s904_s2 + $0xf8] sm:$0xff]  ;;  %s395_s16 = scalar_lea.sflag [#allocation3], %s161_s24 }
  0x17   : > { %s481_s27 = sshll.u32 %s165_s19, 4  ;;  %v186_v57 = vld [vmem:[%s903_s1] sm:$0xff]  ;;  %v551_v58 = vpack.c.bf16 %v284_v52, %v283_v51  ;;  %v553_v59 = vpack.c.bf16 %v302_v54, %v301_v53  ;;  %v285_v60 = vld [vmem:[%s904_s2 + $0x70] sm:$0xff]  ;;  %v286_v61 = vld [vmem:[%s904_s2 + $0x78] sm:$0xff] }
  0x18   : > { %s168_s30 = scalar_lea.vmem %s902_s0, %s481_s27  ;;  %521 = vmatpush3.msra.mxu0 %v186_v57  ;;  %v555_v63 = vpack.c.bf16 %v286_v61, %v285_v60  ;;  %s163_s27 = scalar_lea.vmem [#allocation2], %s472_s25 }
  0x19   : > { %v783_v18 = vld [vmem:[%s168_s30] sm:$0xff]  ;;  %v785_v19 = vld [vmem:[%s168_s30 + $0x8] sm:$0xff]  ;;  %536 = vmatpush3.bf16.msra.mxu1 %v535_v23  ;;  %s409_s28 = sshll.u32 %s163_s27, 4  ;;  %s862_s28 = int_to_ptr.vmem [resolvable:$true] %s409_s28 }
  0x1a   : > { %v171_v21 = vadd.f32 %v785_v19, %v783_v18  ;;  %v180_v22 = vrot.slane %v785_v19, 4  ;;  %v174_v30 = vrot.slane %v783_v18, 4  ;;  %538 = vmatprep.subr.bf16.mxu1 %v537_v24  ;;  %v385_v24 = vsub.s32 0, %v191_v3  ;;  %s603_s5 = scalar_lea.vmem %s862_s28, 256  ;;  %p610_p0 = scmp.lt.s32.totalorder %s862_s28, %s608_s7 }
  0x1b   : > { %p604_p11 = scmp.ne.s32.totalorder %s862_s28, %s603_s5  ;;  %p611_p1 = scmp.lt.s32.totalorder %s609_s8, %s603_s5 }
  0x1c   : > { %172 = vadd.xlane.f32.xlu0 %v171_v21  ;;  %v181_v27 = vadd.f32 %v180_v22, %v785_v19  ;;  %v175_v40 = vadd.f32 %v174_v30, %v783_v18 }
  0x1d   : > { %540 = vmatpush3.bf16.msra.mxu1 %v539_v32  ;;  %p605_p12 = pnand %p604_p11, %p729_p5  ;;  %p612_p2 = por %p611_p1, %p610_p0 }
  0x1e   : > { %v182_v31 = vrot.slane %v181_v27, 2  ;;  %542 = vmatprep.subr.bf16.mxu1 %v541_v33  ;;  %v176_v48 = vrot.slane %v175_v40, 2 }
  0x1f   : > { %p606_p13 = pneg %p605_p12 }
  0x20   : > { %v183_v36 = vadd.f32 %v182_v31, %v181_v27  ;;  %v177_v55 = vadd.f32 %v176_v48, %v175_v40 }
  0x21   : > { %544 = vmatpush3.bf16.msra.mxu1 %v543_v41  ;;  %p613_p3 = pnand %p612_p2, %p606_p13 }
  0x22   : > { %v184_v39 = vrot.slane %v183_v36, 1  ;;  %546 = vmatprep.subr.bf16.mxu1 %v545_v42  ;;  %v178_v62 = vrot.slane %v177_v55, 1 }
  0x24   : > { %v185_v45 = vadd.f32 %v184_v39, %v183_v36  ;;  %v179_v0 = vadd.f32 %v178_v62, %v177_v55 }
  0x25   : > { %548 = vmatpush3.bf16.msra.mxu1 %v547_v49 }
  0x26   : > { %367 = vmatprep.mubr.f32.mxu1 %v185_v45  ;;  %550 = vmatprep.subr.bf16.mxu1 %v549_v50 }
  0x29   : > { %552 = vmatpush3.bf16.msra.mxu1 %v551_v58 }
  0x2a   : > { %554 = vmatprep.subr.bf16.mxu1 %v553_v59 }
  0x2d   : > { %556 = vmatpush3.bf16.msra.mxu1 %v555_v63 }
  0x30   : > { %368 = vmatmul.mubr.f32.vlgmr.msra.gmra.mrb[0].mxu1 %v179_v0 }
  0xa9   : > { %v173_v5 = vpop.xlane.xlu0 %172 }
  0xaa   : > { %v193_v6 = vrot.slane %v173_v5, %v192_v4 }
  0xac   : > { %523 = vmatmul.mubr.msk.f32.vlgmr.msra.gmra.mrb[0].mxu0 %vm194_vm1, %v193_v6 }
 0x103   : > { %v517_v7 = vpop.f32.mrb[0].mxu1 }
 0x104   : > { %v518_v8 = vpop.f32.mrb[1].mxu1 }
 0x105   : > { %v519_v9 = vadd.f32 %v518_v8, %v517_v7 }
 0x107   : > { %v373_v10 = vmul.f32 0.5, %v519_v9 }
 0x109   : > { %599 = vtanh.f32 %v373_v10 }
 0x113   : > { %v600_v11 = vpop.eup %599 }
 0x114   : > { %v375_v12 = vadd.f32 1.0, %v600_v11 }
 0x116   : > { %v376_v13 = vmul.f32 0.5, %v375_v12 }
 0x118   : > { %379 = vrot.lane.b32.xlu0 %v376_v13, %s669_s20 }
 0x17f   : > { %v263_v14 = vpop.f32.mrb[0].mxu0 }
 0x180   : > { %v267_v15 = vmul.f32 0.5, %v263_v14  ;;  %v524_v16 = vpop.f32.mrb[1].mxu0 }
 0x182   : > { %601 = vtanh.f32 %v267_v15 }
 0x18a   : > { %v380_v22 = vpop.permute.xlu0 %379 }
 0x18c   : > { %v602_v17 = vpop.eup %601 }
 0x18d   : > { %v269_v20 = vadd.f32 1.0, %v602_v17 }
 0x18f   : > { %v270_v21 = vmul.f32 0.5, %v269_v20 }
 0x191   : > { %v377_v23 = vadd.f32 %v376_v13, %v270_v21 }
 0x193   : > { %v382_v25 = vadd.f32 %v380_v22, %v377_v23 }
 0x195   : > { %v386_v26 = vrot.slane %v382_v25, %v385_v24 }
 0x197   : > { %388 = vbcast.lane.b32.xlu1 %v386_v26, 256 }
 0x209   : > { %v389_v27 = vpop.permute.xlu1 %388 }
 0x20a   : > { %v390_v28 = vmul.f32 %v389_v27, %v783_v18  ;;  %v391_v29 = vmul.f32 %v389_v27, %v785_v19 }
 0x20c   : > { %392 = vst [vmem:[%s163_s27] sm:$0xff] %v390_v28  ;;  %393 = vst [vmem:[%s163_s27 + $0x8] sm:$0xff] %v391_v29 }
 0x20d   : > { %616 = shalt.err (!%p613_p3)
}
 0x20e   : > { %s617_s9 = scalar_lea.hbm %s860_s4, 256  ;;  %s621_s17 = scalar_lea.hbm %s905_s3, 512 }
 0x20f   : > { %p618_p4 = scmp.ne.s32.totalorder %s860_s4, %s617_s9  ;;  %p622_p9 = scmp.lt.u32.totalorder %s860_s4, %s905_s3 }
 0x210   : > { %p623_p10 = scmp.lt.u32.totalorder %s621_s17, %s617_s9  ;;  %p625_p12 = scmp.lt.u32.totalorder %s617_s9, %s860_s4 }
 0x211   : > { %p619_p7 = pnand %p618_p4, %p729_p5 }
 0x212   : > { %p624_p11 = por %p623_p10, %p622_p9 }
 0x213   : > { %p620_p8 = pneg %p619_p7 }
 0x214   : > { %p626_p13 = por %p625_p12, %p624_p11 }
 0x216   : > { %p627_p0 = pnand %p626_p13, %p620_p8 }
 0x218   : > { %630 = shalt.err (!%p627_p0)
}
 0x219   : > { %557 = dma.vmem_to_hbm [thread:$0]  (%p729_p5), %s862_s28, 256, %s860_s4, %s395_s16  }
 0x21a PF: > { %p563_p1 = scmp.ge.s32.totalorder %s665_s15, 2  ;;  %s421_s24 = sand.u32 1, %s653_s12  }
 0x21b   : > { %s422_s25 = scalar_lea.sflag [#allocation3], %s421_s24 }
 0x21c   : > { %p560_p2 = pnand %p563_p1, %p733_p6 }
 0x21e   : > { %648 = dma.done.wait (!%p560_p2), %s422_s25, 256  }
 0x21f   : > { %650 = vsyncadd (!%p560_p2), %s422_s25, 4294967040  ;;  %p13_p3 = scmp.ge.s32.totalorder %s716_s18, 4   ;;  %s908_s12 = smov %s657_s13 }
 0x220   : > { %s909_s13 = smov %s661_s14  ;;  %s910_s14 = smov %s727_s21 }
 0x221   : > { %s911_s15 = smov %s716_s18  ;;  %15 = sbr.rel (!%p13_p3) target bundleno = 3 (0x3), region = 67 }
 0x228   :  { %427 = vsyncpa [#allocation3], 1 }
 0x229   :  { %429 = vsyncpa [#allocation3 + $0x1], 1 }

</bundles_post_ra>
